<compile_context>
chip_gen: v7x
topology: tpu7x:2x2x1
jax: 0.10.0
libtpu: 0.0.40
codegen_flags: <defaults>
</compile_context>

<pallas_src>
import functools

import jax
import jax.numpy as jnp
from jax.experimental import pallas as pl
from jax.experimental.pallas import tpu as pltpu

LANE = 128           # vreg lane width
SUBLANE = 8          # f32 sublane count
_ALIGN = 16          # bf16 sublane-tile height; keeps every packed slice aligned
_BIAS_ROWS = _ALIGN  # bias block padded to one aligned row tile (rows 0..3 used)

TB_CAP = 1024        # max batch-tile rows (pipelining, NOT VMEM, is the limit)
SPLIT_MIN = 256      # batches <= this run as a single grid step


def _round_up(x, m):
    return (x + m - 1) // m * m


def _cdiv(a, b):
    return (a + b - 1) // b


def _batch_tiling(batch):
    """Pick (tile_rows, num_grid_steps) for the batch axis (all Python ints)."""
    if batch <= SPLIT_MIN:
        # Single step; block rows == full array dim, so any batch size is
        # legal and nothing is masked.  Cross-TC sharding at this size would
        # only duplicate the weight DMA.
        return batch, 1
    # >= 2 steps (two v7x TensorCores + DMA/compute overlap), <= TB_CAP rows
    # per tile, < 8 rows of ragged waste in the masked last block.
    nt = max(2, _cdiv(batch, TB_CAP))
    tb = _round_up(_cdiv(batch, nt), SUBLANE)
    return tb, _cdiv(batch, tb)


def _qnet_kernel(x_ref, p_ref, o_ref):
    """Fused 4-layer MLP forward on one (TB, obs) activation tile.

    Packed parameter rows (all 128 lanes wide, bf16):
      [0               : obs_a          ]  w1  (rows >= obs are zero)
      [obs_a           : obs_a + 128    ]  w2  (out dim padded 64 -> 128)
      [obs_a + 128     : obs_a + 256    ]  w3  (padded 32 -> 128)
      [obs_a + 256     : obs_a + 384    ]  w4  (padded action -> 128)
      [obs_a + 384     : obs_a + 384+16 ]  biases: rows 0..3 = b1..b4
    """
    f32 = jnp.float32
    obs = x_ref.shape[1]
    obs_a = p_ref.shape[0] - (3 * LANE + _BIAS_ROWS)

    x = x_ref[...].astype(f32)                                    # (TB, obs)
    # Single aligned (16, 128) tile holding all four bias rows (one vreg).
    bias = p_ref[obs_a + 3 * LANE:obs_a + 3 * LANE + _BIAS_ROWS, :].astype(f32)

    # fc1 + ReLU: contract directly over K=obs (no feature padding needed).
    w1 = p_ref[0:obs, :].astype(f32)
    h = jnp.dot(x, w1, preferred_element_type=f32) + bias[0:1, :]
    h = jnp.maximum(h, 0.0)

    # fc2 + ReLU
    w2 = p_ref[obs_a:obs_a + LANE, :].astype(f32)
    h = jnp.dot(h, w2, preferred_element_type=f32) + bias[1:2, :]
    h = jnp.maximum(h, 0.0)

    # fc3 + ReLU
    w3 = p_ref[obs_a + LANE:obs_a + 2 * LANE, :].astype(f32)
    h = jnp.dot(h, w3, preferred_element_type=f32) + bias[2:3, :]
    h = jnp.maximum(h, 0.0)

    # fc4 (no activation); lane-dense 128-wide store.
    w4 = p_ref[obs_a + 2 * LANE:obs_a + 3 * LANE, :].astype(f32)
    out = jnp.dot(h, w4, preferred_element_type=f32) + bias[3:4, :]
    o_ref[...] = out.astype(o_ref.dtype)


def pack_params(params, dtype=jnp.bfloat16):
    """Zero-pad weights/biases to 128 lanes with 16-row-aligned blocks and pack
    into one contiguous array of shape (round_up(obs,16) + 3*128 + 16, 128).
    bf16 storage halves the weight DMA; the kernel upcasts to f32 in-vreg."""
    obs_size = params["w1"].shape[0]
    obs_a = _round_up(obs_size, _ALIGN)

    def pad2(a, rows, cols):
        a = jnp.asarray(a, jnp.float32)
        return jnp.pad(a, ((0, rows - a.shape[0]), (0, cols - a.shape[1])))

    blocks = [
        pad2(params["w1"], obs_a, LANE),
        pad2(params["w2"], LANE, LANE),
        pad2(params["w3"], LANE, LANE),
        pad2(params["w4"], LANE, LANE),
        jnp.concatenate(
            [pad2(params[f"b{i}"], 1, LANE) for i in range(1, 5)]
            + [jnp.zeros((_BIAS_ROWS - 4, LANE), jnp.float32)], axis=0),
    ]
    return jnp.concatenate(blocks, axis=0).astype(dtype)


@functools.partial(jax.jit, static_argnames=("action_size",))
def qnetwork_forward(state, packed_params, *, action_size):
    """Run the fused QNetwork forward pass via pallas_call.

    state         : [B, obs_size] float array
    packed_params : output of pack_params(params)
    """
    B, obs = state.shape
    obs_a = packed_params.shape[0] - (3 * LANE + _BIAS_ROWS)
    assert obs <= obs_a and action_size <= LANE

    TB, steps = _batch_tiling(B)

    out = pl.pallas_call(
        _qnet_kernel,
        out_shape=jax.ShapeDtypeStruct((B, LANE), jnp.float32),
        grid=(steps,),
        in_specs=[
            # Activations: batch-tiled, double-buffered across the grid.
            # Last dim == full array dim (obs), so no feature padding and no
            # wasted input DMA bytes.
            pl.BlockSpec((TB, obs), lambda i: (i, 0)),
            # Packed bf16 weights + biases: constant block index -> DMA'd once
            # and VMEM-resident across all grid steps (~108 KiB).
            pl.BlockSpec(packed_params.shape, lambda i: (0, 0)),
        ],
        out_specs=pl.BlockSpec((TB, LANE), lambda i: (i, 0)),
        compiler_params=pltpu.CompilerParams(
            dimension_semantics=("parallel",)),
    )(state.astype(jnp.float32), packed_params)

    # TODO(synk): fuse the downstream consumer (argmax action selection or the
    # Q(s,a) gather) into the kernel so only a tiny (B,1) result leaves VMEM,
    # removing the 128-wide writeback and this slice entirely.
    return out[:, :action_size]


def init_params(key, obs_size, action_size):
    """Deterministic init mimicking PyTorch's nn.Linear default
    (uniform in [-1/sqrt(fan_in), 1/sqrt(fan_in)]). Weights stored
    pre-transposed as [in, out], biases as [1, out]."""
    dims = [(obs_size, 128), (128, 64), (64, 32), (32, action_size)]
    params = {}
    for i, (fan_in, fan_out) in enumerate(dims, start=1):
        key, kw, kb = jax.random.split(key, 3)
        bound = 1.0 / jnp.sqrt(jnp.float32(fan_in))
        params[f"w{i}"] = jax.random.uniform(
            kw, (fan_in, fan_out), jnp.float32, -bound, bound)
        params[f"b{i}"] = jax.random.uniform(
            kb, (1, fan_out), jnp.float32, -bound, bound)
    return params


def qnetwork_reference(state, params):
    """Pure-JAX reference for correctness checking."""
    h = jnp.maximum(state @ params["w1"] + params["b1"], 0.0)
    h = jnp.maximum(h @ params["w2"] + params["b2"], 0.0)
    h = jnp.maximum(h @ params["w3"] + params["b3"], 0.0)
    return h @ params["w4"] + params["b4"]


if __name__ == "__main__":
    # Banana env: 37-dim observation, 4 actions; small online-inference batch.
    obs_size, action_size, batch = 37, 4, 2

    key = jax.random.PRNGKey(0)
    key, k_state = jax.random.split(key)
    params = init_params(key, obs_size, action_size)
    state = jax.random.normal(k_state, (batch, obs_size), jnp.float32)

    packed = pack_params(params)                       # bf16 storage
    # Reference using the same bf16-rounded parameters (apples-to-apples
    # check of the kernel itself).
    params_rt = {k: v.astype(jnp.bfloat16).astype(jnp.float32)
                 for k, v in params.items()}

    out = jax.block_until_ready(
        qnetwork_forward(state, packed, action_size=action_size))
    ref = qnetwork_reference(state, params_rt)
    assert out.shape == (batch, action_size), out.shape
    assert jnp.allclose(out, ref, atol=2e-4, rtol=2e-4), (
        f"mismatch: max abs err {jnp.max(jnp.abs(out - ref))}")

    # Semantics of the original f32 module are preserved up to the one-time
    # bf16 rounding of the parameters (~0.2% relative).
    ref_f32 = qnetwork_reference(state, params)
    assert jnp.allclose(out, ref_f32, atol=2e-2, rtol=2e-2), (
        f"bf16 drift too large: {jnp.max(jnp.abs(out - ref_f32))}")

    # Replay/eval-sized batch: exercises grid=2 (both v7x TensorCores), the
    # ragged masked last block (600 -> tiles of 304 + 296), and weight reuse
    # across grid steps.
    big_state = jax.random.normal(
        jax.random.PRNGKey(1), (600, obs_size), jnp.float32)
    big_out = jax.block_until_ready(
        qnetwork_forward(big_state, packed, action_size=action_size))
    big_ref = qnetwork_reference(big_state, params_rt)
    assert big_out.shape == (600, action_size), big_out.shape
    assert jnp.allclose(big_out, big_ref, atol=2e-4, rtol=2e-4), (
        f"mismatch(big): max abs err {jnp.max(jnp.abs(big_out - big_ref))}")

    print("KERNEL_OK")
</pallas_src>

<mosaic_0001>
module attributes {stable_mosaic.version = 11 : i64} {
  func.func @_qnet_kernel(%arg0: i32, %arg1: memref<2x37xf32, #tpu.memory_space<vmem>>, %arg2: memref<448x128xbf16, #tpu.memory_space<vmem>>, %arg3: memref<2x128xf32, #tpu.memory_space<vmem>>) attributes {dimension_semantics = [#tpu.dimension_semantics<parallel>], iteration_bounds = array<i64: 1>, scalar_prefetch = 0 : i64, scratch_operands = 0 : i64, tpu.core_type = #tpu.core_type<tc>, window_params = [{transform_indices = @transform_0, window_bounds = array<i64: 2, 37>}, {pipeline_mode = #tpu.pipeline_mode<synchronous>, transform_indices = @transform_1, window_bounds = array<i64: 448, 128>}, {transform_indices = @transform_2, window_bounds = array<i64: 2, 128>}]} {
    %c0 = arith.constant 0 : index
    %c0_0 = arith.constant 0 : index
    %0 = vector.load %arg1[%c0, %c0_0] : memref<2x37xf32, #tpu.memory_space<vmem>>, vector<2x37xf32>
    %c432 = arith.constant 432 : index
    %c0_1 = arith.constant 0 : index
    %1 = vector.load %arg2[%c432, %c0_1] : memref<448x128xbf16, #tpu.memory_space<vmem>>, vector<16x128xbf16>
    %2 = arith.extf %1 : vector<16x128xbf16> to vector<16x128xf32>
    %c0_2 = arith.constant 0 : index
    %c0_3 = arith.constant 0 : index
    %3 = vector.load %arg2[%c0_2, %c0_3] : memref<448x128xbf16, #tpu.memory_space<vmem>>, vector<37x128xbf16>
    %4 = arith.extf %3 : vector<37x128xbf16> to vector<37x128xf32>
    %cst = arith.constant dense<0.000000e+00> : vector<2x128xf32>
    %5 = tpu.matmul %0, %4, %cst {dimension_numbers = #tpu.dot_dimension_numbers<[1], [0], [0], [1], [0, 0, 1, 1], [], []>} : vector<2x37xf32>, vector<37x128xf32>, vector<2x128xf32> -> vector<2x128xf32>
    %6 = vector.extract_strided_slice %2 {offsets = [0, 0], sizes = [1, 128], strides = [1, 1]} : vector<16x128xf32> to vector<1x128xf32>
    %7 = vector.broadcast %6 : vector<1x128xf32> to vector<2x128xf32>
    %8 = arith.addf %5, %7 : vector<2x128xf32>
    %cst_4 = arith.constant 0.000000e+00 : f32
    %9 = vector.broadcast %cst_4 : f32 to vector<2x128xf32>
    %10 = arith.maximumf %8, %9 : vector<2x128xf32>
    %c48 = arith.constant 48 : index
    %c0_5 = arith.constant 0 : index
    %11 = vector.load %arg2[%c48, %c0_5] : memref<448x128xbf16, #tpu.memory_space<vmem>>, vector<128x128xbf16>
    %12 = arith.extf %11 : vector<128x128xbf16> to vector<128x128xf32>
    %cst_6 = arith.constant dense<0.000000e+00> : vector<2x128xf32>
    %13 = tpu.matmul %10, %12, %cst_6 {dimension_numbers = #tpu.dot_dimension_numbers<[1], [0], [0], [1], [0, 0, 1, 1], [], []>} : vector<2x128xf32>, vector<128x128xf32>, vector<2x128xf32> -> vector<2x128xf32>
    %14 = vector.extract_strided_slice %2 {offsets = [1, 0], sizes = [1, 128], strides = [1, 1]} : vector<16x128xf32> to vector<1x128xf32>
    %15 = vector.broadcast %14 : vector<1x128xf32> to vector<2x128xf32>
    %16 = arith.addf %13, %15 : vector<2x128xf32>
    %cst_7 = arith.constant 0.000000e+00 : f32
    %17 = vector.broadcast %cst_7 : f32 to vector<2x128xf32>
    %18 = arith.maximumf %16, %17 : vector<2x128xf32>
    %c176 = arith.constant 176 : index
    %c0_8 = arith.constant 0 : index
    %19 = vector.load %arg2[%c176, %c0_8] : memref<448x128xbf16, #tpu.memory_space<vmem>>, vector<128x128xbf16>
    %20 = arith.extf %19 : vector<128x128xbf16> to vector<128x128xf32>
    %cst_9 = arith.constant dense<0.000000e+00> : vector<2x128xf32>
    %21 = tpu.matmul %18, %20, %cst_9 {dimension_numbers = #tpu.dot_dimension_numbers<[1], [0], [0], [1], [0, 0, 1, 1], [], []>} : vector<2x128xf32>, vector<128x128xf32>, vector<2x128xf32> -> vector<2x128xf32>
    %22 = vector.extract_strided_slice %2 {offsets = [2, 0], sizes = [1, 128], strides = [1, 1]} : vector<16x128xf32> to vector<1x128xf32>
    %23 = vector.broadcast %22 : vector<1x128xf32> to vector<2x128xf32>
    %24 = arith.addf %21, %23 : vector<2x128xf32>
    %cst_10 = arith.constant 0.000000e+00 : f32
    %25 = vector.broadcast %cst_10 : f32 to vector<2x128xf32>
    %26 = arith.maximumf %24, %25 : vector<2x128xf32>
    %c304 = arith.constant 304 : index
    %c0_11 = arith.constant 0 : index
    %27 = vector.load %arg2[%c304, %c0_11] : memref<448x128xbf16, #tpu.memory_space<vmem>>, vector<128x128xbf16>
    %28 = arith.extf %27 : vector<128x128xbf16> to vector<128x128xf32>
    %cst_12 = arith.constant dense<0.000000e+00> : vector<2x128xf32>
    %29 = tpu.matmul %26, %28, %cst_12 {dimension_numbers = #tpu.dot_dimension_numbers<[1], [0], [0], [1], [0, 0, 1, 1], [], []>} : vector<2x128xf32>, vector<128x128xf32>, vector<2x128xf32> -> vector<2x128xf32>
    %30 = vector.extract_strided_slice %2 {offsets = [3, 0], sizes = [1, 128], strides = [1, 1]} : vector<16x128xf32> to vector<1x128xf32>
    %31 = vector.broadcast %30 : vector<1x128xf32> to vector<2x128xf32>
    %32 = arith.addf %29, %31 : vector<2x128xf32>
    %c0_13 = arith.constant 0 : index
    %c0_14 = arith.constant 0 : index
    %33 = vector.load %arg3[%c0_13, %c0_14] : memref<2x128xf32, #tpu.memory_space<vmem>>, vector<2x128xf32>
    tpu.vector_store %arg3[%c0_13, %c0_14], %32 {strides = array<i32>} : memref<2x128xf32, #tpu.memory_space<vmem>>, vector<2x128xf32>,
    return
  }
  func.func @transform_0(%arg0: i32) -> (i32, i32) {
    %c0_i32 = arith.constant 0 : i32
    %c0_i32_0 = arith.constant 0 : i32
    return %arg0, %c0_i32 : i32, i32
  }
  func.func @transform_1(%arg0: i32) -> (i32, i32) {
    %c0_i32 = arith.constant 0 : i32
    %c0_i32_0 = arith.constant 0 : i32
    %c0_i32_1 = arith.constant 0 : i32
    return %c0_i32, %c0_i32_0 : i32, i32
  }
  func.func @transform_2(%arg0: i32) -> (i32, i32) {
    %c0_i32 = arith.constant 0 : i32
    %c0_i32_0 = arith.constant 0 : i32
    return %arg0, %c0_i32 : i32, i32
  }
}

</mosaic_0001>

<bundles_post_ra>
// kernel: qnetwork_forward.1
= control target key start
LH: loop header
LB: loop body
LE: loop exit
PB: predicated region body
PF: predicated region fallthrough
CT: control target
= control target key end

     0   :  { %7 = vsyncpa [#allocation3], 0  ;;  %s1036_s0 = inlined_call_operand.hbm [shape: f32[2,37], index: 0, kind: input, shape index: {}]   ;;  %s1037_s1 = inlined_call_operand.hbm [shape: bf16[448,128], index: 1, kind: input, shape index: {}]   ;;  %s1038_s2 = inlined_call_operand.hbm [shape: f32[2,128], index: 2, kind: output, shape index: {}]  }
   0x1   :  { %8 = vsyncpa [#allocation6], 0 }
   0x2   :  { %9 = vsyncpa [#allocation4], 0  ;;  %s935_s9 = smov [#allocation2]   ;;  %s936_s11 = smov [#allocation5]  }
   0x3   :  { %s16_s10 = sshll.u32 %s935_s9, 4  ;;  %s25_s12 = sshll.u32 %s936_s11, 4  ;;  %s17_s10 = int_to_ptr.vmem [resolvable:$true] %s16_s10  ;;  %s958_s12 = int_to_ptr.vmem [resolvable:$true] %s25_s12 }
   0x4   :  { %s863_s15 = scalar_lea.hbm %s1036_s0, 32 }
   0x5   :  { %p864_p0 = scmp.ne.s32.totalorder %s1036_s0, %s863_s15  ;;  %p867_p1 = scmp.lt.u32.totalorder %s863_s15, %s1036_s0 }
   0x7   :  { %p869_p2 = pnand %p867_p1, %p864_p0 }
   0x9   :  { %872 = shalt.err (!%p869_p2)
}
   0xa   :  { %s873_s20 = scalar_lea.vmem %s17_s10, 32  ;;  %p878_p4 = scmp.lt.s32.totalorder %s17_s10, %s17_s10 }
   0xb   :  { %p874_p3 = scmp.ne.s32.totalorder %s17_s10, %s873_s20  ;;  %p879_p5 = scmp.lt.s32.totalorder %s873_s20, %s873_s20 }
   0xd   :  { %p880_p6 = por %p879_p5, %p878_p4 }
   0xf   :  { %p881_p7 = pnand %p880_p6, %p874_p3 }
  0x11   :  { %884 = shalt.err (!%p881_p7)
}
  0x12   :  { %19 = dma.hbm_to_vmem [thread:$0]  %s1036_s0, 32, %s17_s10, [#allocation3]  }
  0x13   :  { %s885_s25 = scalar_lea.hbm %s1037_s1, 3584 }
  0x14   :  { %p886_p8 = scmp.ne.s32.totalorder %s1037_s1, %s885_s25  ;;  %p889_p9 = scmp.lt.u32.totalorder %s885_s25, %s1037_s1 }
  0x16   :  { %p891_p10 = pnand %p889_p9, %p886_p8 }
  0x18   :  { %894 = shalt.err (!%p891_p10)
}
  0x19   :  { %s895_s30 = scalar_lea.vmem %s958_s12, 3584  ;;  %p900_p12 = scmp.lt.s32.totalorder %s958_s12, %s958_s12 }
  0x1a   :  { %p896_p11 = scmp.ne.s32.totalorder %s958_s12, %s895_s30  ;;  %p901_p13 = scmp.lt.s32.totalorder %s895_s30, %s895_s30 }
  0x1c   :  { %p902_p0 = por %p901_p13, %p900_p12 }
  0x1e   :  { %p903_p1 = pnand %p902_p0, %p896_p11 }
  0x20   :  { %906 = shalt.err (!%p903_p1)
}
  0x21   :  { %s937_s0 = smov 64   ;;  %s938_s3 = smov 4  }
  0x22   :  { %31 = dma.hbm_to_vmem [thread:$0]  %s1037_s1, 3584, %s958_s12, [#allocation6], %s937_s0, %s937_s0, %s938_s3  }
  0x23   :  { %929 = dma.done.wait [#allocation3], 32  }
  0x24   :  { %930 = vsyncadd [#allocation3], 4294967264 }
  0x25   :  { %931 = dma.done.wait [#allocation6], 3584  }
  0x26   :  { %932 = vsyncadd [#allocation6], 4294963712  ;;  %v939_v0 = vmov 0.0|0.0   ;;  %vm940_vm0 = vmmov 0   ;;  %v941_v1 = vmov 0.0   ;;  %v474_v2 = vld [vmem:[#allocation5] sm:$0xff]   ;;  %v51_v22 = vlaneseq }
  0x27   :  { %777 = vmatprep.subr.bf16.mxu0 %v939_v0  ;;  %669 = vmatprep.mubr.msk.f32.mxu0 %vm940_vm0, %v941_v1  ;;  %v578_v3 = vld [vmem:[#allocation5 + $0x18] sm:$0xff]   ;;  %v577_v4 = vld [vmem:[#allocation5 + $0x8] sm:$0xff]   ;;  %v45_v5 = vld [vmem:[#allocation5 + $0x10] sm:$0x7]  ;;  %vm59_vm1 = vcmask 1044480   ;;  %vm55_vm2 = vcmask 302080  }
  0x28   :  { %783 = vmatprep.subr.bf16.mxu1 %v939_v0  ;;  %704 = vmatprep.mubr.msk.f32.mxu1 %vm940_vm0, %v941_v1  ;;  %v579_v6 = vld [vmem:[#allocation5 + $0x20] sm:$0xff]   ;;  %v50_v7 = vunpack.c.l.bf16 %v45_v5  ;;  %v38_v8 = vld [vmem:[#allocation2] sm:$0x3]  ;;  %v580_v9 = vld [vmem:[#allocation5 + $0x28] sm:$0xff]   ;;  %v52_v23 = vshrl.u32 %v51_v22, 7  ;;  %s942_s1 = smov [#allocation7]  }
  0x29   :  { %779 = vmatpush3.bf16.msra.mxu0 %v474_v2  ;;  %785 = vmatpush3.bf16.msra.mxu1 %v578_v3  ;;  %v581_v10 = vld [vmem:[#allocation5 + $0x30] sm:$0xff]   ;;  %v582_v11 = vld [vmem:[#allocation5 + $0x38] sm:$0xff]   ;;  %v583_v12 = vld [vmem:[#allocation5 + $0x40] sm:$0xff]   ;;  %s461_s6 = sshll.u32 %s942_s1, 4  ;;  %s462_s6 = int_to_ptr.vmem [resolvable:$true] %s461_s6 }
  0x2a   :  { %780 = vmatprep.subr.bf16.mxu0 %v939_v0  ;;  %786 = vmatprep.subr.bf16.mxu1 %v939_v0  ;;  %v584_v13 = vld [vmem:[#allocation5 + $0x48] sm:$0xff]   ;;  %v585_v14 = vld [vmem:[#allocation5 + $0x50] sm:$0xff]   ;;  %v586_v15 = vld [vmem:[#allocation5 + $0x58] sm:$0xff]   ;;  %v53_v26 = vsub.s32 0, %v52_v23  ;;  %v168_v40 = vsub.s32 1, %v52_v23  ;;  %v275_v47 = vsub.s32 2, %v52_v23  ;;  %p912_p3 = scmp.lt.s32.totalorder %s462_s6, %s462_s6 }
  0x2b   :  { %v587_v16 = vld [vmem:[#allocation5 + $0x60] sm:$0xff]   ;;  %v588_v17 = vld [vmem:[#allocation5 + $0x68] sm:$0xff]   ;;  %v589_v18 = vld [vmem:[#allocation5 + $0x70] sm:$0xff]   ;;  %v382_v53 = vsub.s32 3, %v52_v23  ;;  %s907_s7 = scalar_lea.vmem %s462_s6, 32 }
  0x2c   :  { %v590_v19 = vld [vmem:[#allocation5 + $0x78] sm:$0xff]   ;;  %v591_v20 = vld [vmem:[#allocation5 + $0x80] sm:$0xff]   ;;  %v592_v21 = vld [vmem:[#allocation5 + $0x88] sm:$0xff]   ;;  %p908_p2 = scmp.ne.s32.totalorder %s462_s6, %s907_s7  ;;  %p913_p4 = scmp.lt.s32.totalorder %s907_s7, %s907_s7 }
  0x2d   :  { %782 = vmatpush3.bf16.msra.mxu0 %v577_v4  ;;  %788 = vmatpush3.bf16.msra.mxu1 %v579_v6  ;;  %v39_v24 = vld [vmem:[#allocation5 + $0xd8] sm:$0xf]  ;;  %v593_v32 = vld [vmem:[#allocation5 + $0x90] sm:$0xff]   ;;  %v595_v34 = vld [vmem:[#allocation5 + $0xa0] sm:$0xff]  }
  0x2e   :  { %667 = vmatprep.subr.mxu0 %v941_v1  ;;  %789 = vmatprep.subr.bf16.mxu1 %v939_v0  ;;  %v40_v25 = vunpack.c.l.bf16 %v39_v24  ;;  %v594_v33 = vld [vmem:[#allocation5 + $0x98] sm:$0xff]   ;;  %v596_v35 = vld [vmem:[#allocation5 + $0xa8] sm:$0xff]   ;;  %v597_v36 = vld [vmem:[#allocation5 + $0xb0] sm:$0xff]   ;;  %p914_p5 = por %p913_p4, %p912_p3 }
  0x2f   :  { %v598_v37 = vld [vmem:[#allocation5 + $0xb8] sm:$0xff]   ;;  %v599_v38 = vld [vmem:[#allocation5 + $0xc0] sm:$0xff]   ;;  %v600_v39 = vld [vmem:[#allocation5 + $0xc8] sm:$0xff]  }
  0x30   :  { %v54_v27 = vrot.slane %v40_v25, %v53_v26  ;;  %v169_v41 = vrot.slane %v40_v25, %v168_v40  ;;  %v601_v46 = vld [vmem:[#allocation5 + $0xd0] sm:$0xff]   ;;  %v276_v48 = vrot.slane %v40_v25, %v275_v47  ;;  %v383_v54 = vrot.slane %v40_v25, %v382_v53  ;;  %p915_p6 = pnand %p914_p5, %p908_p2 }
  0x31   :  { %668 = vmatpush3.msk.msra.mxu0 %vm59_vm1, %v50_v7  ;;  %791 = vmatpush3.bf16.msra.mxu1 %v580_v9 }
  0x32   :  { %670 = vmatmul.mubr.msk.f32.vlgmr.msra.gmra.mrb[0].mxu0 %vm55_vm2, %v38_v8  ;;  %792 = vmatprep.subr.bf16.mxu1 %v939_v0 }
  0x33   :  { %807 = vmatprep.subr.bf16.mxu0 %v939_v0  ;;  %739 = vmatprep.mubr.msk.f32.mxu0 %vm940_vm0, %v941_v1 }
  0x34   :  { %809 = vmatpush3.bf16.msra.mxu0 %v586_v15 }
  0x35   :  { %794 = vmatpush3.bf16.msra.mxu1 %v581_v10  ;;  %810 = vmatprep.subr.bf16.mxu0 %v939_v0 }
  0x36   :  { %795 = vmatprep.subr.bf16.mxu1 %v939_v0 }
  0x38   :  { %812 = vmatpush3.bf16.msra.mxu0 %v587_v16 }
  0x39   :  { %797 = vmatpush3.bf16.msra.mxu1 %v582_v11  ;;  %813 = vmatprep.subr.bf16.mxu0 %v939_v0 }
  0x3a   :  { %798 = vmatprep.subr.bf16.mxu1 %v939_v0 }
  0x3c   :  { %815 = vmatpush3.bf16.msra.mxu0 %v588_v17 }
  0x3d   :  { %800 = vmatpush3.bf16.msra.mxu1 %v583_v12  ;;  %816 = vmatprep.subr.bf16.mxu0 %v939_v0 }
  0x3e   :  { %801 = vmatprep.subr.bf16.mxu1 %v939_v0 }
  0x40   :  { %818 = vmatpush3.bf16.msra.mxu0 %v589_v18 }
  0x41   :  { %803 = vmatpush3.bf16.msra.mxu1 %v584_v13  ;;  %819 = vmatprep.subr.bf16.mxu0 %v939_v0 }
  0x42   :  { %804 = vmatprep.subr.bf16.mxu1 %v939_v0 }
  0x44   :  { %821 = vmatpush3.bf16.msra.mxu0 %v590_v19 }
  0x45   :  { %806 = vmatpush3.bf16.msra.mxu1 %v585_v14  ;;  %822 = vmatprep.subr.bf16.mxu0 %v939_v0 }
  0x46   :  { %831 = vmatprep.subr.bf16.mxu1 %v939_v0 }
  0x48   :  { %824 = vmatpush3.bf16.msra.mxu0 %v591_v20 }
  0x49   :  { %825 = vmatprep.subr.bf16.mxu0 %v939_v0 }
  0x4c   :  { %827 = vmatpush3.bf16.msra.mxu0 %v592_v21 }
  0x4d   :  { %828 = vmatprep.subr.bf16.mxu0 %v939_v0 }
  0x50   :  { %830 = vmatpush3.bf16.msra.mxu0 %v593_v32 }
 0x105   :  { %v129_v28 = vpop.f32.mrb[0].mxu0 }
 0x106   :  { %v130_v29 = vadd.f32 %v129_v28, %v54_v27  ;;  %v671_v30 = vpop.f32.mrb[1].mxu0 }
 0x108   :  { %v133_v31 = vmax.f32 %v130_v29, 0.0 }
 0x10a   :  { %705 = vmatmul.mubr.f32.vlgmr.msra.gmra.mrb[0].mxu1 %v133_v31 }
 0x10b   :  { %774 = vmatprep.mubr.msk.f32.mxu1 %vm940_vm0, %v941_v1  ;;  %833 = vmatpush3.bf16.msra.mxu1 %v594_v33 }
 0x10c   :  { %834 = vmatprep.subr.bf16.mxu1 %v939_v0 }
 0x10f   :  { %836 = vmatpush3.bf16.msra.mxu1 %v595_v34 }
 0x110   :  { %837 = vmatprep.subr.bf16.mxu1 %v939_v0 }
 0x113   :  { %839 = vmatpush3.bf16.msra.mxu1 %v596_v35 }
 0x114   :  { %840 = vmatprep.subr.bf16.mxu1 %v939_v0 }
 0x117   :  { %842 = vmatpush3.bf16.msra.mxu1 %v597_v36 }
 0x118   :  { %843 = vmatprep.subr.bf16.mxu1 %v939_v0 }
 0x11b   :  { %845 = vmatpush3.bf16.msra.mxu1 %v598_v37 }
 0x11c   :  { %846 = vmatprep.subr.bf16.mxu1 %v939_v0 }
 0x11f   :  { %848 = vmatpush3.bf16.msra.mxu1 %v599_v38 }
 0x120   :  { %849 = vmatprep.subr.bf16.mxu1 %v939_v0 }
 0x123   :  { %851 = vmatpush3.bf16.msra.mxu1 %v600_v39 }
 0x124   :  { %852 = vmatprep.subr.bf16.mxu1 %v939_v0 }
 0x127   :  { %854 = vmatpush3.bf16.msra.mxu1 %v601_v46 }
 0x1dd   :  { %v236_v42 = vpop.f32.mrb[0].mxu1 }
 0x1de   :  { %v237_v43 = vadd.f32 %v236_v42, %v169_v41  ;;  %v706_v44 = vpop.f32.mrb[1].mxu1 }
 0x1e0   :  { %v240_v45 = vmax.f32 %v237_v43, 0.0 }
 0x1e2   :  { %740 = vmatmul.mubr.f32.vlgmr.msra.gmra.mrb[2].mxu0 %v240_v45 }
 0x2b5   :  { %v343_v49 = vpop.f32.mrb[2].mxu0 }
 0x2b6   :  { %v344_v50 = vadd.f32 %v343_v49, %v276_v48  ;;  %v741_v51 = vpop.f32.mrb[3].mxu0 }
 0x2b8   :  { %v347_v52 = vmax.f32 %v344_v50, 0.0 }
 0x2ba   :  { %775 = vmatmul.mubr.f32.vlgmr.msra.gmra.mrb[2].mxu1 %v347_v52 }
 0x38d   :  { %v450_v55 = vpop.f32.mrb[2].mxu1 }
 0x38e   :  { %v451_v56 = vadd.f32 %v450_v55, %v383_v54  ;;  %v776_v57 = vpop.f32.mrb[3].mxu1 }
 0x390   :  { %454 = vst [vmem:[#allocation7] sm:$0x3] %v451_v56 }
 0x391   :  { %918 = shalt.err (!%p915_p6)
}
 0x392   :  { %s919_s10 = scalar_lea.hbm %s1038_s2, 32 }
 0x393   :  { %p920_p7 = scmp.ne.s32.totalorder %s1038_s2, %s919_s10  ;;  %p923_p8 = scmp.lt.u32.totalorder %s919_s10, %s1038_s2 }
 0x395   :  { %p925_p9 = pnand %p923_p8, %p920_p7 }
 0x397   :  { %928 = shalt.err (!%p925_p9)
}
 0x398   :  { %464 = dma.vmem_to_hbm [thread:$0]  %s462_s6, 32, %s1038_s2, [#allocation4]  }
 0x399   :  { %933 = dma.done.wait [#allocation4], 32  }
 0x39a   :  { %934 = vsyncadd [#allocation4], 4294967264 }
 0x39b   :  { %468 = vsyncpa [#allocation3], 1 }
 0x39c   :  { %469 = vsyncpa [#allocation6], 1 }
 0x39d   :  { %470 = vsyncpa [#allocation4], 1 }

</bundles_post_ra>
